<compile_context>
chip_gen: v7x
topology: tpu7x:2x2x1
jax: 0.10.0
libtpu: 0.0.40
codegen_flags: <defaults>
</compile_context>

<pallas_src>
import functools
import math
from typing import NamedTuple

import jax
import jax.numpy as jnp
from jax.experimental import pallas as pl
from jax.experimental.pallas import tpu as pltpu

LOG_SIG_MAX = 2.0
LOG_SIG_MIN = -20.0

_MIB = 1024 * 1024


def _round_up(x, m):
    return ((x + m - 1) // m) * m


def _pad2(x, rows, cols):
    r, c = x.shape
    return jnp.pad(x, ((0, rows - r), (0, cols - c)))


class PreparedParams(NamedTuple):
    """Pre-fused / pre-padded / pre-cast weights (build once, reuse per call)."""
    w1: jax.Array   # (num_inputs, h_pad)   -- K stays unpadded
    b1: jax.Array   # (1, h_pad)  f32
    w2: jax.Array   # (h_pad, h_pad)
    b2: jax.Array   # (1, h_pad)  f32
    wh: jax.Array   # (h_pad, a2_pad)       -- fused [mean | log_std] head
    bh: jax.Array   # (1, a2_pad) f32


def prepare_params(params, compute_dtype=jnp.bfloat16):
    """One-time weight prep: fuse the two heads, pad lane dims to 128, cast.

    Doing this per forward call would re-read/write every weight matrix in HBM
    on every step; hoisting it out removes that traffic entirely.
    """
    w1, b1, w2, b2, wm, bm, ws, bs = params
    num_inputs, hidden = w1.shape
    num_actions = wm.shape[1]
    h_pad = _round_up(hidden, 128)
    a2_pad = _round_up(2 * num_actions, 128)

    wh = jnp.concatenate([wm, ws], axis=1)   # one (H, 2A) head matmul
    bh = jnp.concatenate([bm, bs], axis=1)

    prepared = PreparedParams(
        w1=_pad2(w1, num_inputs, h_pad).astype(compute_dtype),
        b1=_pad2(b1, 1, h_pad).astype(jnp.float32),
        w2=_pad2(w2, h_pad, h_pad).astype(compute_dtype),
        b2=_pad2(b2, 1, h_pad).astype(jnp.float32),
        wh=_pad2(wh, h_pad, a2_pad).astype(compute_dtype),
        bh=_pad2(bh, 1, a2_pad).astype(jnp.float32),
    )
    return prepared, num_actions


def gaussian_policy_kernel(
    s_ref,            # (TB, num_inputs)   unpadded feature dim
    w1_ref, b1_ref,   # (num_inputs, h_pad), (1, h_pad)
    w2_ref, b2_ref,   # (h_pad, h_pad), (1, h_pad)
    wh_ref, bh_ref,   # (h_pad, a2_pad), (1, a2_pad)   fused [mean | log_std]
    out_ref,          # (TB, a2_pad)   fused [mean | log_std] output slab
    *,
    num_actions,
):
    # Cast the streamed state tile to the matmul compute dtype (bf16 default);
    # accumulation / bias / ReLU / clamp stay in f32.
    x = s_ref[...].astype(w1_ref.dtype)

    # linear1 + relu
    h1 = jnp.dot(x, w1_ref[...], preferred_element_type=jnp.float32) + b1_ref[...]
    h1 = jnp.maximum(h1, 0.0)

    # linear2 + relu
    h2 = jnp.dot(h1.astype(w2_ref.dtype), w2_ref[...],
                 preferred_element_type=jnp.float32) + b2_ref[...]
    h2 = jnp.maximum(h2, 0.0)

    # fused mean / log_std head: one matmul, one lane-dense output slab
    out = jnp.dot(h2.astype(wh_ref.dtype), wh_ref[...],
                  preferred_element_type=jnp.float32) + bh_ref[...]

    # clamp only the log_std columns [A, 2A) of the fused output
    col = jax.lax.broadcasted_iota(jnp.int32, out.shape, dimension=1)
    is_log_std = (col >= num_actions) & (col < 2 * num_actions)
    out = jnp.where(is_log_std, jnp.clip(out, LOG_SIG_MIN, LOG_SIG_MAX), out)

    out_ref[...] = out.astype(out_ref.dtype)


@functools.lru_cache(maxsize=1)
def _single_buffering_supported():
    """True if pipeline_mode=pl.Buffered(1) lowers on this JAX/Mosaic.

    Single-buffering constant-index (resident) blocks halves their VMEM
    footprint.  The probe uses jit().lower().compile() on abstract shapes, so
    it is safe to call even while tracing and never executes on device.
    """
    if not hasattr(pl, "Buffered"):
        return False
    try:
        def _probe_kernel(a_ref, o_ref):
            o_ref[...] = a_ref[...] + 1.0

        probe = pl.pallas_call(
            _probe_kernel,
            grid=(2,),
            in_specs=[pl.BlockSpec((8, 128), lambda i: (0, 0),
                                   pipeline_mode=pl.Buffered(1))],
            out_specs=pl.BlockSpec((8, 128), lambda i: (i, 0)),
            out_shape=jax.ShapeDtypeStruct((16, 128), jnp.float32),
        )
        jax.jit(probe).lower(
            jax.ShapeDtypeStruct((8, 128), jnp.float32)).compile()
        return True
    except Exception:
        return False


def _vmem_estimate(rows, in_dim, h_pad, a2_pad, compute_dtype, state_dtype,
                   weight_bufs, io_bufs):
    """Rough VMEM byte estimate: resident weights + streamed tiles + temps."""
    cb = jnp.dtype(compute_dtype).itemsize
    sb = jnp.dtype(state_dtype).itemsize
    weights = (in_dim * h_pad + h_pad * h_pad + h_pad * a2_pad) * cb
    biases = (2 * h_pad + a2_pad) * 4
    io = rows * in_dim * sb + rows * a2_pad * 4
    temps = rows * (2 * h_pad * (4 + cb) + in_dim * cb + a2_pad * 4)
    return (weights + biases) * weight_bufs + io * io_bufs + temps


def _vmem_limit_bytes(estimate):
    # Raise the scoped-VMEM limit above the 16/32 MiB defaults when needed but
    # never above v7x's 64 MiB physical VMEM per TensorCore.
    # TODO(synk): re-derive the tiling (smaller TB / K-split) for hidden >= ~2K f32.
    return int(min(64 * _MIB, max(32 * _MIB, 1.5 * estimate + 4 * _MIB)))


def gaussian_policy_forward(state, prepared, *, num_actions,
                            batch_tile=1024, min_batch_tile=128):
    """GaussianPolicy.forward(state) -> (mean, log_std) via one Pallas call.

    `prepared` comes from prepare_params() (fused/padded/cast once, reused
    across calls).  `state` is passed with its native feature dim (no lane
    padding) and native dtype (cast to the compute dtype inside the kernel).
    """
    w1, b1, w2, b2, wh, bh = prepared
    B, in_dim = state.shape
    assert in_dim == w1.shape[0], "state feature dim does not match params"
    h_pad = w1.shape[1]
    a2_pad = wh.shape[1]
    a2 = 2 * num_actions
    compute_dtype = w1.dtype

    kernel = functools.partial(gaussian_policy_kernel, num_actions=num_actions)
    args = (state, w1, b1, w2, b2, wh, bh)

    if B < 2 * min_batch_tile:
        # Small batch: grid-less call, whole arrays resident in VMEM, no
        # padding or extra copies at all.
        est = _vmem_estimate(max(B, 8), in_dim, h_pad, a2_pad, compute_dtype,
                             state.dtype, weight_bufs=1, io_bufs=1)
        vmem = pl.BlockSpec(memory_space=pltpu.MemorySpace.VMEM)
        out = pl.pallas_call(
            kernel,
            in_specs=[vmem] * len(args),
            out_specs=vmem,
            out_shape=jax.ShapeDtypeStruct((B, a2_pad), jnp.float32),
            compiler_params=pltpu.CompilerParams(
                vmem_limit_bytes=_vmem_limit_bytes(est)),
        )(*args)
    else:
        # Batch-tiled path: weights VMEM-resident (constant block index), the
        # batch axis is "parallel" so a v7x megacore shards tiles across both
        # TensorCores (no-op on single-TC v5e/v6e).  Medium batches get >= 2
        # tiles (~B/2 rows each); large batches use batch_tile rows per step.
        TB = min(batch_tile, _round_up((B + 1) // 2, 16))
        n_tiles = (B + TB - 1) // TB
        B_pad = TB * n_tiles
        if B_pad != B:
            # Pad only the batch remainder; the feature dim stays num_inputs.
            state_in = jnp.pad(state, ((0, B_pad - B), (0, 0)))
        else:
            state_in = state
        args = (state_in,) + args[1:]

        single_buf = _single_buffering_supported()
        resident_kwargs = {"pipeline_mode": pl.Buffered(1)} if single_buf else {}

        def resident(arr):
            # Constant index_map -> DMA'd once; single-buffered when supported.
            return pl.BlockSpec(arr.shape, lambda i: (0, 0), **resident_kwargs)

        est = _vmem_estimate(TB, in_dim, h_pad, a2_pad, compute_dtype,
                             state.dtype,
                             weight_bufs=1 if single_buf else 2, io_bufs=2)

        in_specs = [pl.BlockSpec((TB, in_dim), lambda i: (i, 0))]
        in_specs += [resident(a) for a in args[1:]]

        out = pl.pallas_call(
            kernel,
            grid=(n_tiles,),
            in_specs=in_specs,
            out_specs=pl.BlockSpec((TB, a2_pad), lambda i: (i, 0)),
            out_shape=jax.ShapeDtypeStruct((B_pad, a2_pad), jnp.float32),
            compiler_params=pltpu.CompilerParams(
                dimension_semantics=("parallel",),
                vmem_limit_bytes=_vmem_limit_bytes(est),
            ),
        )(*args)

    # Slice the padded slab once to (B, 2A), then split mean / log_std from
    # the small fused view (avoids re-reading the padded slab twice).
    fused = out[:B, :a2]
    mean = fused[:, :num_actions]
    log_std = fused[:, num_actions:]
    return mean, log_std


# ----------------------------- init / reference -----------------------------

def xavier_uniform(key, out_features, in_features):
    """torch.nn.init.xavier_uniform_ with gain=1 on a (out, in) weight."""
    bound = math.sqrt(6.0 / (in_features + out_features))
    return jax.random.uniform(
        key, (out_features, in_features), dtype=jnp.float32,
        minval=-bound, maxval=bound,
    )


def init_params(key, num_inputs, num_actions, hidden_dim):
    k1, k2, k3, k4 = jax.random.split(key, 4)
    # PyTorch weight layout is (out, in); transpose to (in, out) for x @ W.
    w1 = xavier_uniform(k1, hidden_dim, num_inputs).T
    b1 = jnp.zeros((1, hidden_dim), jnp.float32)
    w2 = xavier_uniform(k2, hidden_dim, hidden_dim).T
    b2 = jnp.zeros((1, hidden_dim), jnp.float32)
    wm = xavier_uniform(k3, num_actions, hidden_dim).T
    bm = jnp.zeros((1, num_actions), jnp.float32)
    ws = xavier_uniform(k4, num_actions, hidden_dim).T
    bs = jnp.zeros((1, num_actions), jnp.float32)
    return (w1, b1, w2, b2, wm, bm, ws, bs)


def reference_forward(state, params):
    """Pure-JAX reference of GaussianPolicy.forward for a sanity check."""
    w1, b1, w2, b2, wm, bm, ws, bs = params
    h1 = jnp.maximum(state @ w1 + b1, 0.0)
    h2 = jnp.maximum(h1 @ w2 + b2, 0.0)
    mean = h2 @ wm + bm
    log_std = jnp.clip(h2 @ ws + bs, LOG_SIG_MIN, LOG_SIG_MAX)
    return mean, log_std


if __name__ == "__main__":
    num_inputs, num_actions, hidden_dim = 16, 8, 32

    key = jax.random.PRNGKey(0)
    k_params, k_s1, k_s2, k_s3 = jax.random.split(key, 4)
    params = init_params(k_params, num_inputs, num_actions, hidden_dim)

    # One-time weight prep (hoisted out of the per-call path).
    prep_bf16, A = prepare_params(params)                        # bf16 default
    prep_f32, _ = prepare_params(params, compute_dtype=jnp.float32)

    fwd = jax.jit(functools.partial(gaussian_policy_forward, num_actions=A))

    # --- small batch: grid-less path, f32 operands (exact vs reference) ---
    s_small = jax.random.normal(k_s1, (8, num_inputs), jnp.float32)
    mean_f32, log_std_f32 = jax.block_until_ready(fwd(s_small, prep_f32))
    ref_mean_s, ref_log_std_s = reference_forward(s_small, params)
    assert jnp.allclose(mean_f32, ref_mean_s, atol=1e-5, rtol=1e-5)
    assert jnp.allclose(log_std_f32, ref_log_std_s, atol=1e-5, rtol=1e-5)

    # --- small batch: grid-less path, bf16 operands (default) ---
    mean_bf, log_std_bf = jax.block_until_ready(fwd(s_small, prep_bf16))
    assert jnp.allclose(mean_bf, ref_mean_s, atol=5e-2, rtol=5e-2)
    assert jnp.allclose(log_std_bf, ref_log_std_s, atol=5e-2, rtol=5e-2)

    # --- ragged batch: tiled path with a batch-remainder pad, f32 (exact) ---
    s_ragged = jax.random.normal(k_s2, (300, num_inputs), jnp.float32)
    mean_r, log_std_r = jax.block_until_ready(fwd(s_ragged, prep_f32))
    ref_mean_r, ref_log_std_r = reference_forward(s_ragged, params)
    assert mean_r.shape == (300, num_actions)
    assert log_std_r.shape == (300, num_actions)
    assert jnp.allclose(mean_r, ref_mean_r, atol=1e-5, rtol=1e-5)
    assert jnp.allclose(log_std_r, ref_log_std_r, atol=1e-5, rtol=1e-5)

    # --- larger batch: tiled path (2 parallel tiles), bf16 operands ---
    s_big = jax.random.normal(k_s3, (512, num_inputs), jnp.float32)
    mean_b, log_std_b = jax.block_until_ready(fwd(s_big, prep_bf16))
    ref_mean_b, ref_log_std_b = reference_forward(s_big, params)
    assert jnp.allclose(mean_b, ref_mean_b, atol=5e-2, rtol=5e-2)
    assert jnp.allclose(log_std_b, ref_log_std_b, atol=5e-2, rtol=5e-2)

    # NOTE: sample() (rsample + tanh squashing + log-prob) is not part of
    # forward(); forward() returns (mean, log_std) only, which the kernel
    # implements.
    print("KERNEL_OK")
</pallas_src>

<mosaic_0001>
module attributes {stable_mosaic.version = 11 : i64} {
  func.func @gaussian_policy_kernel(%arg0: memref<8x16xf32, #tpu.memory_space<vmem>>, %arg1: memref<16x128xf32, #tpu.memory_space<vmem>>, %arg2: memref<1x128xf32, #tpu.memory_space<vmem>>, %arg3: memref<128x128xf32, #tpu.memory_space<vmem>>, %arg4: memref<1x128xf32, #tpu.memory_space<vmem>>, %arg5: memref<128x128xf32, #tpu.memory_space<vmem>>, %arg6: memref<1x128xf32, #tpu.memory_space<vmem>>, %arg7: memref<8x128xf32, #tpu.memory_space<vmem>>) attributes {dimension_semantics = [], scalar_prefetch = 0 : i64, scratch_operands = 0 : i64, tpu.core_type = #tpu.core_type<tc>} {
    %c0 = arith.constant 0 : index
    %c0_0 = arith.constant 0 : index
    %0 = vector.load %arg0[%c0, %c0_0] : memref<8x16xf32, #tpu.memory_space<vmem>>, vector<8x16xf32>
    %c0_1 = arith.constant 0 : index
    %c0_2 = arith.constant 0 : index
    %1 = vector.load %arg1[%c0_1, %c0_2] : memref<16x128xf32, #tpu.memory_space<vmem>>, vector<16x128xf32>
    %cst = arith.constant dense<0.000000e+00> : vector<8x128xf32>
    %2 = tpu.matmul %0, %1, %cst {dimension_numbers = #tpu.dot_dimension_numbers<[1], [0], [0], [1], [0, 0, 1, 1], [], []>} : vector<8x16xf32>, vector<16x128xf32>, vector<8x128xf32> -> vector<8x128xf32>
    %c0_3 = arith.constant 0 : index
    %c0_4 = arith.constant 0 : index
    %3 = vector.load %arg2[%c0_3, %c0_4] : memref<1x128xf32, #tpu.memory_space<vmem>>, vector<1x128xf32>
    %4 = vector.broadcast %3 : vector<1x128xf32> to vector<8x128xf32>
    %5 = arith.addf %2, %4 : vector<8x128xf32>
    %cst_5 = arith.constant 0.000000e+00 : f32
    %6 = vector.broadcast %cst_5 : f32 to vector<8x128xf32>
    %7 = arith.maximumf %5, %6 : vector<8x128xf32>
    %c0_6 = arith.constant 0 : index
    %c0_7 = arith.constant 0 : index
    %8 = vector.load %arg3[%c0_6, %c0_7] : memref<128x128xf32, #tpu.memory_space<vmem>>, vector<128x128xf32>
    %cst_8 = arith.constant dense<0.000000e+00> : vector<8x128xf32>
    %9 = tpu.matmul %7, %8, %cst_8 {dimension_numbers = #tpu.dot_dimension_numbers<[1], [0], [0], [1], [0, 0, 1, 1], [], []>} : vector<8x128xf32>, vector<128x128xf32>, vector<8x128xf32> -> vector<8x128xf32>
    %c0_9 = arith.constant 0 : index
    %c0_10 = arith.constant 0 : index
    %10 = vector.load %arg4[%c0_9, %c0_10] : memref<1x128xf32, #tpu.memory_space<vmem>>, vector<1x128xf32>
    %11 = vector.broadcast %10 : vector<1x128xf32> to vector<8x128xf32>
    %12 = arith.addf %9, %11 : vector<8x128xf32>
    %cst_11 = arith.constant 0.000000e+00 : f32
    %13 = vector.broadcast %cst_11 : f32 to vector<8x128xf32>
    %14 = arith.maximumf %12, %13 : vector<8x128xf32>
    %c0_12 = arith.constant 0 : index
    %c0_13 = arith.constant 0 : index
    %15 = vector.load %arg5[%c0_12, %c0_13] : memref<128x128xf32, #tpu.memory_space<vmem>>, vector<128x128xf32>
    %cst_14 = arith.constant dense<0.000000e+00> : vector<8x128xf32>
    %16 = tpu.matmul %14, %15, %cst_14 {dimension_numbers = #tpu.dot_dimension_numbers<[1], [0], [0], [1], [0, 0, 1, 1], [], []>} : vector<8x128xf32>, vector<128x128xf32>, vector<8x128xf32> -> vector<8x128xf32>
    %c0_15 = arith.constant 0 : index
    %c0_16 = arith.constant 0 : index
    %17 = vector.load %arg6[%c0_15, %c0_16] : memref<1x128xf32, #tpu.memory_space<vmem>>, vector<1x128xf32>
    %18 = vector.broadcast %17 : vector<1x128xf32> to vector<8x128xf32>
    %19 = arith.addf %16, %18 : vector<8x128xf32>
    %20 = tpu.iota {dimensions = array<i32: 1>} : vector<8x128xi32>
    %c8_i32 = arith.constant 8 : i32
    %21 = vector.broadcast %c8_i32 : i32 to vector<8x128xi32>
    %22 = arith.cmpi sge, %20, %21 : vector<8x128xi32>
    %c16_i32 = arith.constant 16 : i32
    %23 = vector.broadcast %c16_i32 : i32 to vector<8x128xi32>
    %24 = arith.cmpi slt, %20, %23 : vector<8x128xi32>
    %25 = arith.andi %22, %24 : vector<8x128xi1>
    %cst_17 = arith.constant -2.000000e+01 : f32
    %cst_18 = arith.constant 2.000000e+00 : f32
    %26 = vector.broadcast %cst_17 : f32 to vector<8x128xf32>
    %27 = arith.maximumf %26, %19 : vector<8x128xf32>
    %28 = vector.broadcast %cst_18 : f32 to vector<8x128xf32>
    %29 = arith.minimumf %28, %27 : vector<8x128xf32>
    %30 = arith.select %25, %29, %19 : vector<8x128xi1>, vector<8x128xf32>
    %c0_19 = arith.constant 0 : index
    %c0_20 = arith.constant 0 : index
    %31 = vector.load %arg7[%c0_19, %c0_20] : memref<8x128xf32, #tpu.memory_space<vmem>>, vector<8x128xf32>
    tpu.vector_store %arg7[%c0_19, %c0_20], %30 {strides = array<i32>} : memref<8x128xf32, #tpu.memory_space<vmem>>, vector<8x128xf32>,
    return
  }
}

</mosaic_0001>

<bundles_post_ra>
// kernel: gaussian_policy_forward.1
= control target key start
LH: loop header
LB: loop body
LE: loop exit
PB: predicated region body
PF: predicated region fallthrough
CT: control target
= control target key end

     0   :  { %12 = vsyncpa [#allocation3], 0  ;;  %s777_s0 = inlined_call_operand.hbm [shape: f32[8,16], index: 0, kind: input, shape index: {}]   ;;  %s778_s1 = inlined_call_operand.hbm [shape: f32[16,128], index: 1, kind: input, shape index: {}]   ;;  %s779_s2 = inlined_call_operand.vmem [shape: f32[1,128], index: 2, kind: input, shape index: {}]   ;;  %s780_s3 = inlined_call_operand.hbm [shape: f32[128,128], index: 3, kind: input, shape index: {}]   ;;  %s781_s4 = inlined_call_operand.vmem [shape: f32[1,128], index: 4, kind: input, shape index: {}]   ;;  %s782_s5 = inlined_call_operand.hbm [shape: f32[128,128], index: 5, kind: input, shape index: {}]   ;;  %s783_s6 = inlined_call_operand.vmem [shape: f32[1,128], index: 6, kind: input, shape index: {}]   ;;  %s784_s7 = inlined_call_operand.vmem [shape: f32[8,128], index: 7, kind: output, shape index: {}]  }
   0x1   :  { %13 = vsyncpa [#allocation5], 0 }
   0x2   :  { %14 = vsyncpa [#allocation8], 0  ;;  %s639_s24 = smov [#allocation4]   ;;  %s545_s28 = scalar_lea.hbm %s778_s1, 256 }
   0x3   :  { %s30_s25 = sshll.u32 %s639_s24, 4  ;;  %p546_p0 = scmp.ne.s32.totalorder %s778_s1, %s545_s28  ;;  %s31_s25 = int_to_ptr.vmem [resolvable:$true] %s30_s25 }
   0x4   :  { %p549_p1 = scmp.lt.u32.totalorder %s545_s28, %s778_s1 }
   0x6   :  { %p551_p2 = pnand %p549_p1, %p546_p0 }
   0x8   :  { %554 = shalt.err (!%p551_p2)
}
   0x9   :  { %s555_s10 = scalar_lea.vmem %s31_s25, 256  ;;  %p560_p4 = scmp.lt.s32.totalorder %s31_s25, %s31_s25 }
   0xa   :  { %p556_p3 = scmp.ne.s32.totalorder %s31_s25, %s555_s10  ;;  %p561_p5 = scmp.lt.s32.totalorder %s555_s10, %s555_s10 }
   0xc   :  { %p562_p6 = por %p561_p5, %p560_p4 }
   0xe   :  { %p563_p7 = pnand %p562_p6, %p556_p3 }
  0x10   :  { %566 = shalt.err (!%p563_p7)
}
  0x11   :  { %s640_s11 = smov 128   ;;  %s641_s12 = smov 8  }
  0x12   :  { %36 = dma.hbm_to_vmem [thread:$0]  %s778_s1, 256, %s31_s25, [#allocation5], %s640_s11, %s640_s11, %s641_s12  }
  0x13   :  { %s642_s15 = smov [#allocation2]   ;;  %s643_s17 = smov [#allocation6]  }
  0x14   :  { %s21_s16 = sshll.u32 %s642_s15, 4  ;;  %s44_s18 = sshll.u32 %s643_s17, 4  ;;  %s22_s16 = int_to_ptr.vmem [resolvable:$true] %s21_s16  ;;  %s45_s18 = int_to_ptr.vmem [resolvable:$true] %s44_s18 }
  0x15   :  { %s567_s21 = scalar_lea.hbm %s777_s0, 128 }
  0x16   :  { %p568_p8 = scmp.ne.s32.totalorder %s777_s0, %s567_s21  ;;  %p571_p9 = scmp.lt.u32.totalorder %s567_s21, %s777_s0 }
  0x18   :  { %p573_p10 = pnand %p571_p9, %p568_p8 }
  0x1a   :  { %576 = shalt.err (!%p573_p10)
}
  0x1b   :  { %s577_s1 = scalar_lea.vmem %s22_s16, 128  ;;  %p582_p12 = scmp.lt.s32.totalorder %s22_s16, %s22_s16 }
  0x1c   :  { %p578_p11 = scmp.ne.s32.totalorder %s22_s16, %s577_s1  ;;  %p583_p13 = scmp.lt.s32.totalorder %s577_s1, %s577_s1 }
  0x1e   :  { %p584_p0 = por %p583_p13, %p582_p12 }
  0x20   :  { %p585_p1 = pnand %p584_p0, %p578_p11 }
  0x22   :  { %588 = shalt.err (!%p585_p1)
}
  0x23   :  { %24 = dma.hbm_to_vmem [thread:$0]  %s777_s0, 128, %s22_s16, [#allocation3]  }
  0x24   :  { %s589_s30 = scalar_lea.hbm %s780_s3, 2048 }
  0x25   :  { %p590_p2 = scmp.ne.s32.totalorder %s780_s3, %s589_s30  ;;  %p593_p3 = scmp.lt.u32.totalorder %s589_s30, %s780_s3 }
  0x27   :  { %p595_p4 = pnand %p593_p3, %p590_p2 }
  0x29   :  { %598 = shalt.err (!%p595_p4)
}
  0x2a   :  { %s599_s14 = scalar_lea.vmem %s45_s18, 2048  ;;  %p604_p6 = scmp.lt.s32.totalorder %s45_s18, %s45_s18 }
  0x2b   :  { %p600_p5 = scmp.ne.s32.totalorder %s45_s18, %s599_s14  ;;  %p605_p7 = scmp.lt.s32.totalorder %s599_s14, %s599_s14 }
  0x2d   :  { %p606_p8 = por %p605_p7, %p604_p6 }
  0x2f   :  { %p607_p9 = pnand %p606_p8, %p600_p5 }
  0x31   :  { %610 = shalt.err (!%p607_p9)
}
  0x32   :  { %50 = dma.hbm_to_vmem [thread:$0]  %s780_s3, 2048, %s45_s18, [#allocation5], %s640_s11, %s640_s11, %s641_s12  }
  0x33   :  { %s644_s16 = smov [#allocation7]   ;;  %s611_s21 = scalar_lea.hbm %s782_s5, 2048 }
  0x34   :  { %s58_s17 = sshll.u32 %s644_s16, 4  ;;  %p612_p10 = scmp.ne.s32.totalorder %s782_s5, %s611_s21  ;;  %s59_s17 = int_to_ptr.vmem [resolvable:$true] %s58_s17 }
  0x35   :  { %p615_p11 = scmp.lt.u32.totalorder %s611_s21, %s782_s5 }
  0x37   :  { %p617_p12 = pnand %p615_p11, %p612_p10 }
  0x39   :  { %620 = shalt.err (!%p617_p12)
}
  0x3a   :  { %s621_s1 = scalar_lea.vmem %s59_s17, 2048  ;;  %p626_p0 = scmp.lt.s32.totalorder %s59_s17, %s59_s17 }
  0x3b   :  { %p622_p13 = scmp.ne.s32.totalorder %s59_s17, %s621_s1  ;;  %p627_p1 = scmp.lt.s32.totalorder %s621_s1, %s621_s1 }
  0x3d   :  { %p628_p2 = por %p627_p1, %p626_p0 }
  0x3f   :  { %p629_p3 = pnand %p628_p2, %p622_p13 }
  0x41   :  { %632 = shalt.err (!%p629_p3)
}
  0x42   :  { %64 = dma.hbm_to_vmem [thread:$0]  %s782_s5, 2048, %s59_s17, [#allocation8], %s640_s11, %s640_s11, %s641_s12  }
  0x43   :  { %633 = dma.done.wait [#allocation3], 128  }
  0x44   :  { %634 = vsyncadd [#allocation3], 4294967168 }
  0x45   :  { %635 = dma.done.wait [#allocation5], 2304  }
  0x46   :  { %636 = vsyncadd [#allocation5], 4294964992 }
  0x47   :  { %637 = dma.done.wait [#allocation8], 2048  }
  0x48   :  { %638 = vsyncadd [#allocation8], 4294965248  ;;  %v645_v0 = vmov 0.0|0.0   ;;  %vm646_vm0 = vmmov 0   ;;  %v647_v1 = vmov 0.0   ;;  %v80_v2 = vld [vmem:[#allocation4] sm:$0xff] }
  0x49   :  { %485 = vmatprep.subr.bf16.mxu0 %v645_v0  ;;  %412 = vmatprep.mubr.msk.f32.mxu0 %vm646_vm0, %v647_v1  ;;  %v81_v3 = vld [vmem:[#allocation4 + $0x8] sm:$0xff]  ;;  %v164_v5 = vld [vmem:[#allocation6] sm:$0xff]  ;;  %v165_v6 = vld [vmem:[#allocation6 + $0x8] sm:$0xff]  ;;  %vm89_vm1 = vcmask 130048  }
  0x4a   :  { %488 = vmatprep.subr.bf16.mxu1 %v645_v0  ;;  %447 = vmatprep.mubr.msk.f32.mxu1 %vm646_vm0, %v647_v1  ;;  %v486_v4 = vpack.c.bf16 %v81_v3, %v80_v2  ;;  %v166_v7 = vld [vmem:[#allocation6 + $0x10] sm:$0xff]  ;;  %v489_v8 = vpack.c.bf16 %v165_v6, %v164_v5  ;;  %v167_v9 = vld [vmem:[#allocation6 + $0x18] sm:$0xff]  ;;  %v79_v10 = vld [vmem:[#allocation2] sm:$0xff] }
  0x4b   :  { %v492_v11 = vpack.c.bf16 %v167_v9, %v166_v7  ;;  %v168_v12 = vld [vmem:[#allocation6 + $0x20] sm:$0xff]  ;;  %v169_v13 = vld [vmem:[#allocation6 + $0x28] sm:$0xff]  ;;  %v170_v15 = vld [vmem:[#allocation6 + $0x30] sm:$0xff] }
  0x4c   :  { %487 = vmatpush3.bf16.msra.mxu0 %v486_v4  ;;  %490 = vmatpush3.bf16.msra.mxu1 %v489_v8  ;;  %v495_v14 = vpack.c.bf16 %v169_v13, %v168_v12  ;;  %v171_v16 = vld [vmem:[#allocation6 + $0x38] sm:$0xff]  ;;  %v172_v18 = vld [vmem:[#allocation6 + $0x40] sm:$0xff]  ;;  %v173_v19 = vld [vmem:[#allocation6 + $0x48] sm:$0xff] }
  0x4d   :  { %512 = vmatprep.subr.bf16.mxu0 %v645_v0  ;;  %491 = vmatprep.subr.bf16.mxu1 %v645_v0  ;;  %v498_v17 = vpack.c.bf16 %v171_v16, %v170_v15  ;;  %v501_v20 = vpack.c.bf16 %v173_v19, %v172_v18  ;;  %v174_v21 = vld [vmem:[#allocation6 + $0x50] sm:$0xff]  ;;  %v175_v22 = vld [vmem:[#allocation6 + $0x58] sm:$0xff]  ;;  %v176_v24 = vld [vmem:[#allocation6 + $0x60] sm:$0xff] }
  0x4e   :  { %v504_v23 = vpack.c.bf16 %v175_v22, %v174_v21  ;;  %v177_v25 = vld [vmem:[#allocation6 + $0x68] sm:$0xff]  ;;  %v178_v27 = vld [vmem:[#allocation6 + $0x70] sm:$0xff]  ;;  %v179_v28 = vld [vmem:[#allocation6 + $0x78] sm:$0xff] }
  0x4f   :  { %413 = vmatmul.mubr.msk.f32.vlgmr.msra.gmra.mrb[0].mxu0 %vm89_vm1, %v79_v10  ;;  %v507_v26 = vpack.c.bf16 %v177_v25, %v176_v24  ;;  %v510_v29 = vpack.c.bf16 %v179_v28, %v178_v27  ;;  %v258_v30 = vld [vmem:[#allocation7] sm:$0xff]  ;;  %v259_v31 = vld [vmem:[#allocation7 + $0x8] sm:$0xff]  ;;  %v260_v32 = vld [vmem:[#allocation7 + $0x10] sm:$0xff] }
  0x50   :  { %482 = vmatprep.mubr.msk.f32.mxu0 %vm646_vm0, %v647_v1  ;;  %493 = vmatpush3.bf16.msra.mxu1 %v492_v11  ;;  %v513_v33 = vpack.c.bf16 %v259_v31, %v258_v30  ;;  %v261_v34 = vld [vmem:[#allocation7 + $0x18] sm:$0xff]  ;;  %v262_v36 = vld [vmem:[#allocation7 + $0x20] sm:$0xff]  ;;  %v263_v37 = vld [vmem:[#allocation7 + $0x28] sm:$0xff] }
  0x51   :  { %494 = vmatprep.subr.bf16.mxu1 %v645_v0  ;;  %v516_v35 = vpack.c.bf16 %v261_v34, %v260_v32  ;;  %v519_v38 = vpack.c.bf16 %v263_v37, %v262_v36  ;;  %v264_v39 = vld [vmem:[#allocation7 + $0x30] sm:$0xff]  ;;  %v265_v40 = vld [vmem:[#allocation7 + $0x38] sm:$0xff]  ;;  %v266_v42 = vld [vmem:[#allocation7 + $0x40] sm:$0xff] }
  0x52   :  { %514 = vmatpush3.bf16.msra.mxu0 %v513_v33  ;;  %v522_v41 = vpack.c.bf16 %v265_v40, %v264_v39  ;;  %v267_v43 = vld [vmem:[#allocation7 + $0x48] sm:$0xff]  ;;  %v268_v45 = vld [vmem:[#allocation7 + $0x50] sm:$0xff]  ;;  %v269_v46 = vld [vmem:[#allocation7 + $0x58] sm:$0xff] }
  0x53   :  { %515 = vmatprep.subr.bf16.mxu0 %v645_v0  ;;  %v525_v44 = vpack.c.bf16 %v267_v43, %v266_v42  ;;  %v528_v47 = vpack.c.bf16 %v269_v46, %v268_v45  ;;  %v270_v48 = vld [vmem:[#allocation7 + $0x60] sm:$0xff]  ;;  %v271_v49 = vld [vmem:[#allocation7 + $0x68] sm:$0xff]  ;;  %v272_v56 = vld [vmem:[#allocation7 + $0x70] sm:$0xff] }
  0x54   :  { %496 = vmatpush3.bf16.msra.mxu1 %v495_v14  ;;  %v531_v50 = vpack.c.bf16 %v271_v49, %v270_v48  ;;  %v367_v51 = vld [vmem:[%s779_s2] ss:$0 sm:$0xff]  ;;  %v273_v57 = vld [vmem:[#allocation7 + $0x78] sm:$0xff] }
  0x55   :  { %497 = vmatprep.subr.bf16.mxu1 %v645_v0  ;;  %v534_v58 = vpack.c.bf16 %v273_v57, %v272_v56  ;;  %v369_v59 = vld [vmem:[%s781_s4] ss:$0 sm:$0xff] }
  0x56   :  { %517 = vmatpush3.bf16.msra.mxu0 %v516_v35  ;;  %v370_v2 = vld [vmem:[%s783_s6] ss:$0 sm:$0xff] }
  0x57   :  { %518 = vmatprep.subr.bf16.mxu0 %v645_v0 }
  0x58   :  { %499 = vmatpush3.bf16.msra.mxu1 %v498_v17 }
  0x59   :  { %500 = vmatprep.subr.bf16.mxu1 %v645_v0 }
  0x5a   :  { %520 = vmatpush3.bf16.msra.mxu0 %v519_v38 }
  0x5b   :  { %521 = vmatprep.subr.bf16.mxu0 %v645_v0 }
  0x5c   :  { %502 = vmatpush3.bf16.msra.mxu1 %v501_v20 }
  0x5d   :  { %503 = vmatprep.subr.bf16.mxu1 %v645_v0 }
  0x5e   :  { %523 = vmatpush3.bf16.msra.mxu0 %v522_v41 }
  0x5f   :  { %524 = vmatprep.subr.bf16.mxu0 %v645_v0 }
  0x60   :  { %505 = vmatpush3.bf16.msra.mxu1 %v504_v23 }
  0x61   :  { %506 = vmatprep.subr.bf16.mxu1 %v645_v0 }
  0x62   :  { %526 = vmatpush3.bf16.msra.mxu0 %v525_v44 }
  0x63   :  { %527 = vmatprep.subr.bf16.mxu0 %v645_v0 }
  0x64   :  { %508 = vmatpush3.bf16.msra.mxu1 %v507_v26 }
  0x65   :  { %509 = vmatprep.subr.bf16.mxu1 %v645_v0 }
  0x66   :  { %529 = vmatpush3.bf16.msra.mxu0 %v528_v47 }
  0x67   :  { %530 = vmatprep.subr.bf16.mxu0 %v645_v0 }
  0x68   :  { %511 = vmatpush3.bf16.msra.mxu1 %v510_v29 }
  0x6a   :  { %532 = vmatpush3.bf16.msra.mxu0 %v531_v50 }
  0x6b   :  { %533 = vmatprep.subr.bf16.mxu0 %v645_v0  ;;  %v351_v0 = vlaneseq }
  0x6d   :  { %v352_v1 = vand.u32 127, %v351_v0 }
  0x6e   :  { %535 = vmatpush3.bf16.msra.mxu0 %v534_v58 }
  0x6f   :  { %vm353_vm2 = vcmp.ge.s32.totalorder %v352_v1, 8  ;;  %vm354_vm3 = vcmp.lt.s32.totalorder %v352_v1, 16 }
  0x70   :  { %vm355_vm4 = vmand %vm353_vm2, %vm354_vm3 }
 0x122   :  { %v159_v52 = vpop.f32.mrb[0].mxu0 }
 0x123   :  { %v160_v53 = vadd.f32 %v367_v51, %v159_v52  ;;  %v414_v54 = vpop.f32.mrb[1].mxu0 }
 0x125   :  { %v163_v55 = vmax.f32 %v160_v53, 0.0 }
 0x127   :  { %448 = vmatmul.mubr.f32.vlgmr.msra.gmra.mrb[0].mxu1 %v163_v55 }
 0x1fa   :  { %v253_v60 = vpop.f32.mrb[0].mxu1 }
 0x1fb   :  { %v254_v61 = vadd.f32 %v369_v59, %v253_v60  ;;  %v449_v62 = vpop.f32.mrb[1].mxu1 }
 0x1fd   :  { %v257_v63 = vmax.f32 %v254_v61, 0.0 }
 0x1ff   :  { %483 = vmatmul.mubr.f32.vlgmr.msra.gmra.mrb[2].mxu0 %v257_v63 }
 0x2d2   :  { %v347_v3 = vpop.f32.mrb[2].mxu0 }
 0x2d3   :  { %v348_v4 = vadd.f32 %v370_v2, %v347_v3  ;;  %v484_v5 = vpop.f32.mrb[3].mxu0 }
 0x2d5   :  { %v356_v6 = vmax.f32 %v348_v4, -20.0 }
 0x2d7   :  { %v357_v7 = vmin.f32 %v356_v6, 2.0 }
 0x2d9   :  { %v358_v8 = vsel %vm355_vm4, %v357_v7, %v348_v4 }
 0x2da   :  { %359 = vst [vmem:[%s784_s7] sm:$0xff] %v358_v8 }
 0x2db   :  { %364 = vsyncpa [#allocation3], 1 }
 0x2dc   :  { %365 = vsyncpa [#allocation5], 1 }
 0x2dd   :  { %366 = vsyncpa [#allocation8], 1 }

</bundles_post_ra>
